<compile_context>
chip_gen: v6e
topology: v6e:2x2x1
jax: 0.10.0
libtpu: 0.0.40
codegen_flags: <defaults>
</compile_context>

<pallas_src>
import functools

import jax
import jax.numpy as jnp
from jax.experimental import pallas as pl
from jax.experimental.pallas import tpu as pltpu

IN_DIM = 28 * 28            # 784
H1, H2, OUT_DIM = 300, 100, 10
H1P, H2P, OUTP = 384, 128, 128   # lane-padded widths


def _cdiv(a, b):
    return -(-a // b)


def _round_up(a, m):
    return _cdiv(a, m) * m


# --------------------------------------------------------------------------- params
def prepare_params(w1, b1, w2, b2, w3, b3=None):
    """Pad hidden dims to lane multiples and cast weights to bf16, once (hot-path free).

    b3 is accepted for API parity but never used: it is broadcast along dim=0 and
    cancels exactly in the dim-0 softmax.
    """
    del b3
    w1p = jnp.pad(w1, ((0, 0), (0, H1P - H1))).astype(jnp.bfloat16)
    b1p = jnp.pad(jnp.reshape(b1, (1, -1)), ((0, 0), (0, H1P - H1))).astype(jnp.float32)
    w2p = jnp.pad(w2, ((0, H1P - H1), (0, H2P - H2))).astype(jnp.bfloat16)
    b2p = jnp.pad(jnp.reshape(b2, (1, -1)), ((0, 0), (0, H2P - H2))).astype(jnp.float32)
    w3p = jnp.pad(w3, ((0, H2P - H2), (0, OUTP - w3.shape[1]))).astype(jnp.bfloat16)
    return w1p, b1p, w2p, b2p, w3p


# --------------------------------------------------------------------------- kernels
def _mlp(x_f32, w1, b1, w2, b2, w3):
    # bf16 MXU operands, f32 accumulation. No b3 add (cancels in the dim-0 softmax).
    x = x_f32.astype(jnp.bfloat16)
    h1 = jnp.dot(x, w1, preferred_element_type=jnp.float32) + b1
    h1 = jnp.maximum(h1, 0.0)
    h2 = jnp.dot(h1.astype(jnp.bfloat16), w2, preferred_element_type=jnp.float32) + b2
    h2 = jnp.maximum(h2, 0.0)
    return jnp.dot(h2.astype(jnp.bfloat16), w3, preferred_element_type=jnp.float32)


def fused_mlp_softmax_kernel(x_ref, w1_ref, b1_ref, w2_ref, b2_ref, w3_ref, o_ref):
    # Whole batch in one tile: MLP + softmax over dim=0, fused (no logits round trip).
    logits = _mlp(x_ref[...], w1_ref[...], b1_ref[...], w2_ref[...], b2_ref[...],
                  w3_ref[...])
    m = jnp.max(logits, axis=0, keepdims=True)
    e = jnp.exp(logits - m)
    s = jnp.sum(e, axis=0, keepdims=True)
    o_ref[...] = e / s                      # exact division (approx recip was too lossy)


def mlp_stats_kernel(x_ref, w1_ref, b1_ref, w2_ref, b2_ref, w3_ref,
                     logits_ref, stats_ref, *, valid_rows, tile_rows):
    # Batch-tiled MLP + online per-column (max, sum-exp) carried across the grid.
    i = pl.program_id(0)

    @pl.when(i == 0)
    def _():
        stats_ref[0:1, :] = jnp.full((1, OUTP), -jnp.inf, dtype=jnp.float32)
        stats_ref[1:2, :] = jnp.zeros((1, OUTP), dtype=jnp.float32)

    logits = _mlp(x_ref[...], w1_ref[...], b1_ref[...], w2_ref[...], b2_ref[...],
                  w3_ref[...])
    logits_ref[...] = logits.astype(logits_ref.dtype)

    # Rows >= valid_rows only exist in the clipped last tile; mask them out of the
    # softmax statistics (their output stores are clipped by Pallas anyway).
    rows = i * tile_rows + jax.lax.broadcasted_iota(jnp.int32, logits.shape, 0)
    masked = jnp.where(rows < valid_rows, logits, -jnp.inf)

    m_old = stats_ref[0:1, :]
    s_old = stats_ref[1:2, :]
    m_new = jnp.maximum(m_old, jnp.max(masked, axis=0, keepdims=True))
    s_new = s_old * jnp.exp(m_old - m_new) + jnp.sum(jnp.exp(masked - m_new),
                                                     axis=0, keepdims=True)
    stats_ref[0:1, :] = m_new
    stats_ref[1:2, :] = s_new


def softmax_normalize_kernel(logits_ref, stats_ref, o_ref):
    # Tiny row-tiled normalize: out = exp(logit - m) / s with the carried stats.
    logits = logits_ref[...].astype(jnp.float32)
    m = stats_ref[0:1, :]
    s = stats_ref[1:2, :]
    o_ref[...] = jnp.exp(logits - m) / s


# --------------------------------------------------------------------------- wrapper
def _weight_specs(index_map):
    # Constant index maps -> weights/biases stay VMEM-resident across grid steps.
    return [
        pl.BlockSpec((IN_DIM, H1P), index_map),
        pl.BlockSpec((1, H1P), index_map),
        pl.BlockSpec((H1P, H2P), index_map),
        pl.BlockSpec((1, H2P), index_map),
        pl.BlockSpec((H2P, OUTP), index_map),
    ]


def model_forward(x, params, *, out_dim=OUT_DIM, tm=512, fused_row_limit=1024):
    B = x.shape[0]

    if B <= fused_row_limit:
        # Single-tile fast path: blocks equal full array dims (no batch padding at all),
        # one kernel launch, softmax fused -> no logits HBM round trip.
        probs = pl.pallas_call(
            fused_mlp_softmax_kernel,
            out_shape=jax.ShapeDtypeStruct((B, OUTP), jnp.float32),
            grid=(),
            in_specs=[pl.BlockSpec((B, IN_DIM), lambda: (0, 0))]
                     + _weight_specs(lambda: (0, 0)),
            out_specs=pl.BlockSpec((B, OUTP), lambda: (0, 0)),
            compiler_params=pltpu.CompilerParams(vmem_limit_bytes=32 << 20),
        )(x, *params)
        return probs[:, :out_dim]

    # Large-batch path: balanced batch tiles (<= ~7 wasted rows per tile), no jnp.pad
    # of x; online softmax stats carried over an "arbitrary" batch axis, then a small
    # "parallel" row-tiled normalize pass.
    TM = _round_up(_cdiv(B, _cdiv(B, tm)), 8)
    T = _cdiv(B, TM)

    logits, stats = pl.pallas_call(
        functools.partial(mlp_stats_kernel, valid_rows=B, tile_rows=TM),
        out_shape=(jax.ShapeDtypeStruct((B, OUTP), jnp.float32),
                   jax.ShapeDtypeStruct((2, OUTP), jnp.float32)),
        grid=(T,),
        in_specs=[pl.BlockSpec((TM, IN_DIM), lambda i: (i, 0))]
                 + _weight_specs(lambda i: (0, 0)),
        out_specs=(pl.BlockSpec((TM, OUTP), lambda i: (i, 0)),
                   pl.BlockSpec((2, OUTP), lambda i: (0, 0))),   # resident stats carry
        compiler_params=pltpu.CompilerParams(
            dimension_semantics=("arbitrary",),   # carry serializes the batch axis
            vmem_limit_bytes=32 << 20),
    )(x, *params)

    probs = pl.pallas_call(
        softmax_normalize_kernel,
        out_shape=jax.ShapeDtypeStruct((B, OUTP), jnp.float32),
        grid=(T,),
        in_specs=[pl.BlockSpec((TM, OUTP), lambda i: (i, 0)),
                  pl.BlockSpec((2, OUTP), lambda i: (0, 0))],
        out_specs=pl.BlockSpec((TM, OUTP), lambda i: (i, 0)),
        compiler_params=pltpu.CompilerParams(
            dimension_semantics=("parallel",),
            vmem_limit_bytes=32 << 20),
    )(logits, stats)
    return probs[:, :out_dim]


# --------------------------------------------------------------------------- test
def init_params(key):
    # Matches Model.init_weights: weights ~ U(-1/28, 1/28), biases = 0.
    k1, k2, k3 = jax.random.split(key, 3)
    lim = 1.0 / 28.0
    w1 = jax.random.uniform(k1, (IN_DIM, H1), jnp.float32, -lim, lim)
    w2 = jax.random.uniform(k2, (H1, H2), jnp.float32, -lim, lim)
    w3 = jax.random.uniform(k3, (H2, OUT_DIM), jnp.float32, -lim, lim)
    b1 = jnp.zeros((1, H1), jnp.float32)
    b2 = jnp.zeros((1, H2), jnp.float32)
    b3 = jnp.zeros((1, OUT_DIM), jnp.float32)
    return w1, b1, w2, b2, w3, b3


def reference_forward(x, w1, b1, w2, b2, w3, b3):
    h1 = jnp.maximum(x @ w1 + b1, 0.0)
    h2 = jnp.maximum(h1 @ w2 + b2, 0.0)
    logits = h2 @ w3 + b3
    return jax.nn.softmax(logits, axis=0)


if __name__ == "__main__":
    key = jax.random.PRNGKey(0)
    kx1, kx2, kp = jax.random.split(key, 3)
    raw = init_params(kp)
    params = prepare_params(*raw)

    cases = [
        (kx1, 8, dict()),                              # fused single-tile path
        (kx2, 300, dict()),                            # fused path, B not a multiple of 8
        (kx2, 300, dict(fused_row_limit=0, tm=128)),   # force tiled online-softmax path
    ]
    for kx, B, kw in cases:
        x = jax.random.normal(kx, (B, IN_DIM), jnp.float32)
        out = jax.block_until_ready(model_forward(x, params, **kw))
        ref = reference_forward(x, *raw)
        assert out.shape == (B, OUT_DIM), out.shape
        err = float(jnp.max(jnp.abs(out - ref)))
        # bf16 MXU operands -> relaxed tolerance vs the f32 reference.
        assert err < 2e-2, f"mismatch vs reference at B={B}, kw={kw}, max_err={err}"

    print("KERNEL_OK")
</pallas_src>

<mosaic_0001>
module attributes {stable_mosaic.version = 11 : i64} {
  func.func @fused_mlp_softmax_kernel(%arg0: memref<8x784xf32, #tpu.memory_space<vmem>>, %arg1: memref<784x384xbf16, #tpu.memory_space<vmem>>, %arg2: memref<1x384xf32, #tpu.memory_space<vmem>>, %arg3: memref<384x128xbf16, #tpu.memory_space<vmem>>, %arg4: memref<1x128xf32, #tpu.memory_space<vmem>>, %arg5: memref<128x128xbf16, #tpu.memory_space<vmem>>, %arg6: memref<8x128xf32, #tpu.memory_space<vmem>>) attributes {dimension_semantics = [], scalar_prefetch = 0 : i64, scratch_operands = 0 : i64, tpu.core_type = #tpu.core_type<tc>} {
    %c0 = arith.constant 0 : index
    %c0_0 = arith.constant 0 : index
    %0 = vector.load %arg0[%c0, %c0_0] : memref<8x784xf32, #tpu.memory_space<vmem>>, vector<8x784xf32>
    %c0_1 = arith.constant 0 : index
    %c0_2 = arith.constant 0 : index
    %1 = vector.load %arg1[%c0_1, %c0_2] : memref<784x384xbf16, #tpu.memory_space<vmem>>, vector<784x384xbf16>
    %c0_3 = arith.constant 0 : index
    %c0_4 = arith.constant 0 : index
    %2 = vector.load %arg2[%c0_3, %c0_4] : memref<1x384xf32, #tpu.memory_space<vmem>>, vector<1x384xf32>
    %c0_5 = arith.constant 0 : index
    %c0_6 = arith.constant 0 : index
    %3 = vector.load %arg3[%c0_5, %c0_6] : memref<384x128xbf16, #tpu.memory_space<vmem>>, vector<384x128xbf16>
    %c0_7 = arith.constant 0 : index
    %c0_8 = arith.constant 0 : index
    %4 = vector.load %arg4[%c0_7, %c0_8] : memref<1x128xf32, #tpu.memory_space<vmem>>, vector<1x128xf32>
    %c0_9 = arith.constant 0 : index
    %c0_10 = arith.constant 0 : index
    %5 = vector.load %arg5[%c0_9, %c0_10] : memref<128x128xbf16, #tpu.memory_space<vmem>>, vector<128x128xbf16>
    %6 = arith.truncf %0 : vector<8x784xf32> to vector<8x784xbf16>
    %cst = arith.constant dense<0.000000e+00> : vector<8x384xf32>
    %7 = tpu.matmul %6, %1, %cst {dimension_numbers = #tpu.dot_dimension_numbers<[1], [0], [0], [1], [0, 0, 1, 1], [], []>} : vector<8x784xbf16>, vector<784x384xbf16>, vector<8x384xf32> -> vector<8x384xf32>
    %8 = vector.broadcast %2 : vector<1x384xf32> to vector<8x384xf32>
    %9 = arith.addf %7, %8 : vector<8x384xf32>
    %cst_11 = arith.constant 0.000000e+00 : f32
    %10 = vector.broadcast %cst_11 : f32 to vector<8x384xf32>
    %11 = arith.maximumf %9, %10 : vector<8x384xf32>
    %12 = arith.truncf %11 : vector<8x384xf32> to vector<8x384xbf16>
    %cst_12 = arith.constant dense<0.000000e+00> : vector<8x128xf32>
    %13 = tpu.matmul %12, %3, %cst_12 {dimension_numbers = #tpu.dot_dimension_numbers<[1], [0], [0], [1], [0, 0, 1, 1], [], []>} : vector<8x384xbf16>, vector<384x128xbf16>, vector<8x128xf32> -> vector<8x128xf32>
    %14 = vector.broadcast %4 : vector<1x128xf32> to vector<8x128xf32>
    %15 = arith.addf %13, %14 : vector<8x128xf32>
    %cst_13 = arith.constant 0.000000e+00 : f32
    %16 = vector.broadcast %cst_13 : f32 to vector<8x128xf32>
    %17 = arith.maximumf %15, %16 : vector<8x128xf32>
    %18 = arith.truncf %17 : vector<8x128xf32> to vector<8x128xbf16>
    %cst_14 = arith.constant dense<0.000000e+00> : vector<8x128xf32>
    %19 = tpu.matmul %18, %5, %cst_14 {dimension_numbers = #tpu.dot_dimension_numbers<[1], [0], [0], [1], [0, 0, 1, 1], [], []>} : vector<8x128xbf16>, vector<128x128xbf16>, vector<8x128xf32> -> vector<8x128xf32>
    %cst_15 = arith.constant dense<0xFF800000> : vector<128xf32>
    %20 = vector.multi_reduction <maximumf>, %19, %cst_15 [0] : vector<8x128xf32> to vector<128xf32>
    %21 = vector.shape_cast %20 : vector<128xf32> to vector<1x128xf32>
    %22 = vector.broadcast %21 : vector<1x128xf32> to vector<8x128xf32>
    %23 = arith.subf %19, %22 : vector<8x128xf32>
    %24 = math.exp %23 : vector<8x128xf32>
    %cst_16 = arith.constant dense<0.000000e+00> : vector<128xf32>
    %25 = vector.multi_reduction <add>, %24, %cst_16 [0] : vector<8x128xf32> to vector<128xf32>
    %26 = vector.shape_cast %25 : vector<128xf32> to vector<1x128xf32>
    %27 = vector.broadcast %26 : vector<1x128xf32> to vector<8x128xf32>
    %28 = arith.divf %24, %27 : vector<8x128xf32>
    %c0_17 = arith.constant 0 : index
    %c0_18 = arith.constant 0 : index
    %29 = vector.load %arg6[%c0_17, %c0_18] : memref<8x128xf32, #tpu.memory_space<vmem>>, vector<8x128xf32>
    tpu.vector_store %arg6[%c0_17, %c0_18], %28 {strides = array<i32>} : memref<8x128xf32, #tpu.memory_space<vmem>>, vector<8x128xf32>,
    return
  }
}

</mosaic_0001>

<bundles_post_ra>
// kernel: tpu_custom_call.1
= control target key start
LH: loop header
LB: loop body
LE: loop exit
PB: predicated region body
PF: predicated region fallthrough
CT: control target
= control target key end

     0   :  { %11 = vsyncpa [#allocation3], 0  ;;  %s2644_s0 = inlined_call_operand.hbm [shape: f32[8,784], index: 0, kind: input, shape index: {}]   ;;  %s2645_s1 = inlined_call_operand.hbm [shape: bf16[784,384], index: 1, kind: input, shape index: {}]   ;;  %s2646_s2 = inlined_call_operand.vmem [shape: f32[1,384], index: 2, kind: input, shape index: {}]   ;;  %s2647_s3 = inlined_call_operand.hbm [shape: bf16[384,128], index: 3, kind: input, shape index: {}]   ;;  %s2648_s4 = inlined_call_operand.vmem [shape: f32[1,128], index: 4, kind: input, shape index: {}]   ;;  %s2649_s5 = inlined_call_operand.hbm [shape: bf16[128,128], index: 5, kind: input, shape index: {}]   ;;  %s2650_s6 = inlined_call_operand.hbm [shape: f32[8,128], index: 6, kind: output, shape index: {}]  }
   0x1   :  { %12 = vsyncpa [#allocation6], 0 }
   0x2   :  { %13 = vsyncpa [#allocation9], 0 }
   0x3   :  { %14 = vsyncpa [#allocation4], 0  ;;  %s2531_s21 = smov [#allocation5]  }
   0x4   :  { %s30_s22 = sshll.u32 %s2531_s21, 4  ;;  %s31_s22 = int_to_ptr.vmem [resolvable:$true] %s30_s22 }
   0x5   :  { %s2431_s23 = scalar_lea.vmem %s31_s22, 18816  ;;  %p2436_p1 = scmp.lt.s32.totalorder %s31_s22, %s31_s22 }
   0x6   :  { %p2432_p0 = scmp.ne.s32.totalorder %s31_s22, %s2431_s23  ;;  %p2437_p2 = scmp.lt.s32.totalorder %s2431_s23, %s2431_s23 }
   0x8   :  { %p2438_p3 = por %p2437_p2, %p2436_p1 }
   0xa   :  { %p2439_p4 = pnand %p2438_p3, %p2432_p0 }
   0xc   :  { %2442 = shalt.err (!%p2439_p4)
}
   0xd   :  { %s2532_s24 = smov 192   ;;  %s2533_s25 = smov 12  }
   0xe   :  { %36 = dma.hbm_to_vmem [thread:$0]  %s2645_s1, 18816, %s31_s22, [#allocation6], %s2532_s24, %s2532_s24, %s2533_s25  }
   0xf   :  { %s2534_s28 = smov [#allocation2]   ;;  %s2535_s30 = smov [#allocation7]  }
  0x10   :  { %s21_s29 = sshll.u32 %s2534_s28, 4  ;;  %s44_s7 = sshll.u32 %s2535_s30, 4  ;;  %s22_s29 = int_to_ptr.vmem [resolvable:$true] %s21_s29  ;;  %s45_s7 = int_to_ptr.vmem [resolvable:$true] %s44_s7 }
  0x11   :  { %s2451_s8 = scalar_lea.vmem %s22_s29, 896  ;;  %p2456_p6 = scmp.lt.s32.totalorder %s22_s29, %s22_s29 }
  0x12   :  { %p2452_p5 = scmp.ne.s32.totalorder %s22_s29, %s2451_s8  ;;  %p2457_p7 = scmp.lt.s32.totalorder %s2451_s8, %s2451_s8 }
  0x14   :  { %p2458_p8 = por %p2457_p7, %p2456_p6 }
  0x16   :  { %p2459_p9 = pnand %p2458_p8, %p2452_p5 }
  0x18   :  { %2462 = shalt.err (!%p2459_p9)
}
  0x19   :  { %24 = dma.hbm_to_vmem [thread:$0]  %s2644_s0, 896, %s22_s29, [#allocation3]  }
  0x1a   :  { %s2471_s11 = scalar_lea.vmem %s45_s7, 3072  ;;  %p2476_p11 = scmp.lt.s32.totalorder %s45_s7, %s45_s7 }
  0x1b   :  { %p2472_p10 = scmp.ne.s32.totalorder %s45_s7, %s2471_s11  ;;  %p2477_p12 = scmp.lt.s32.totalorder %s2471_s11, %s2471_s11 }
  0x1d   :  { %p2478_p13 = por %p2477_p12, %p2476_p11 }
  0x1f   :  { %p2479_p0 = pnand %p2478_p13, %p2472_p10 }
  0x21   :  { %2482 = shalt.err (!%p2479_p0)
}
  0x22   :  { %s2536_s1 = smov 64   ;;  %s2537_s12 = smov 4  }
  0x23   :  { %50 = dma.hbm_to_vmem [thread:$0]  %s2647_s3, 3072, %s45_s7, [#allocation6], %s2536_s1, %s2536_s1, %s2537_s12  }
  0x24   :  { %s2538_s15 = smov [#allocation8]  }
  0x25   :  { %s58_s16 = sshll.u32 %s2538_s15, 4  ;;  %s59_s16 = int_to_ptr.vmem [resolvable:$true] %s58_s16 }
  0x26   :  { %s2491_s17 = scalar_lea.vmem %s59_s16, 1024  ;;  %p2496_p2 = scmp.lt.s32.totalorder %s59_s16, %s59_s16 }
  0x27   :  { %p2492_p1 = scmp.ne.s32.totalorder %s59_s16, %s2491_s17  ;;  %p2497_p3 = scmp.lt.s32.totalorder %s2491_s17, %s2491_s17 }
  0x29   :  { %p2498_p4 = por %p2497_p3, %p2496_p2 }
  0x2b   :  { %p2499_p5 = pnand %p2498_p4, %p2492_p1 }
  0x2d   :  { %2502 = shalt.err (!%p2499_p5)
}
  0x2e   :  { %64 = dma.hbm_to_vmem [thread:$0]  %s2649_s5, 1024, %s59_s16, [#allocation9], %s2536_s1, %s2536_s1, %s2537_s12  }
  0x2f   :  { %2523 = dma.done.wait [#allocation3], 896  }
  0x30   :  { %2524 = vsyncadd [#allocation3], 4294966400 }
  0x31   :  { %2525 = dma.done.wait [#allocation6], 21888  }
  0x32   :  { %2526 = vsyncadd [#allocation6], 4294945408 }
  0x33   :  { %2527 = dma.done.wait [#allocation9], 1024  }
  0x34   :  { %2528 = vsyncadd [#allocation9], 4294966272  ;;  %v2191_v0 = vld [vmem:[#allocation5 + $0xac] ss:$12 sps:$4 sm:$0xff]   ;;  %v2193_v1 = vld [vmem:[#allocation5 + $0xa8] ss:$12 sps:$4 sm:$0xff]  }
  0x35   :  { %1158 = vmatprep.subr.bf16.mxu0 %v2191_v0  ;;  %v2194_v2 = vld [vmem:[#allocation5 + $0x22c] ss:$12 sps:$4 sm:$0xff]   ;;  %v2196_v3 = vld [vmem:[#allocation5 + $0x228] ss:$12 sps:$4 sm:$0xff]   ;;  %v2199_v5 = vld [vmem:[#allocation5 + $0x90] ss:$12 sps:$4 sm:$0xff]  }
  0x36   :  { %1159 = vmatpush1.bf16.msra.mxu0 %v2193_v1  ;;  %v2197_v4 = vld [vmem:[#allocation5 + $0x94] ss:$12 sps:$4 sm:$0xff]   ;;  %1199 = vmatprep.subr.bf16.mxu1 %v2194_v2  ;;  %v2202_v7 = vld [vmem:[#allocation5 + $0x210] ss:$12 sps:$4 sm:$0xff]   ;;  %v2205_v9 = vld [vmem:[#allocation5 + $0x78] ss:$12 sps:$4 sm:$0xff]  }
  0x37   :  { %v2200_v6 = vld [vmem:[#allocation5 + $0x214] ss:$12 sps:$4 sm:$0xff]   ;;  %1200 = vmatpush1.bf16.msra.mxu1 %v2196_v3  ;;  %1160 = vmatprep.subr.bf16.mxu0 %v2197_v4  ;;  %v2203_v8 = vld [vmem:[#allocation5 + $0x7c] ss:$12 sps:$4 sm:$0xff]   ;;  %v2209_v11 = vld [vmem:[#allocation5 + $0x64] ss:$12 sps:$4 sm:$0xff]  }
  0x38   :  { %1201 = vmatprep.subr.bf16.mxu1 %v2200_v6  ;;  %v2206_v10 = vld [vmem:[#allocation5 + $0x1fc] ss:$12 sps:$4 sm:$0xff]   ;;  %v2208_v12 = vld [vmem:[#allocation5 + $0x1f8] ss:$12 sps:$4 sm:$0xff]   ;;  %v2211_v14 = vld [vmem:[#allocation5 + $0x60] ss:$12 sps:$4 sm:$0xff]  }
  0x39   :  { %v2212_v13 = vld [vmem:[#allocation5 + $0x1e4] ss:$12 sps:$4 sm:$0xff]   ;;  %v2215_v15 = vld [vmem:[#allocation5 + $0x4c] ss:$12 sps:$4 sm:$0xff]   ;;  %v2217_v18 = vld [vmem:[#allocation5 + $0x48] ss:$12 sps:$4 sm:$0xff]  }
  0x3a   :  { %1161 = vmatpush1.bf16.msra.mxu0 %v2199_v5  ;;  %v2214_v16 = vld [vmem:[#allocation5 + $0x1e0] ss:$12 sps:$4 sm:$0xff]   ;;  %v2220_v20 = vld [vmem:[#allocation5 + $0x1c8] ss:$12 sps:$4 sm:$0xff]   ;;  %v2223_v22 = vld [vmem:[#allocation5 + $0x30] ss:$12 sps:$4 sm:$0xff]  }
  0x3b   :  { %1162 = vmatprep.subr.bf16.mxu0 %v2203_v8  ;;  %1202 = vmatpush1.bf16.msra.mxu1 %v2202_v7  ;;  %v2218_v17 = vld [vmem:[#allocation5 + $0x1cc] ss:$12 sps:$4 sm:$0xff]   ;;  %v2221_v19 = vld [vmem:[#allocation5 + $0x34] ss:$12 sps:$4 sm:$0xff]   ;;  %v2227_v23 = vld [vmem:[#allocation5 + $0x1c] ss:$12 sps:$4 sm:$0xff]  }
  0x3c   :  { %1203 = vmatprep.subr.bf16.mxu1 %v2206_v10  ;;  %v2224_v21 = vld [vmem:[#allocation5 + $0x1b4] ss:$12 sps:$4 sm:$0xff]   ;;  %v2226_v24 = vld [vmem:[#allocation5 + $0x1b0] ss:$12 sps:$4 sm:$0xff]   ;;  %v2229_v26 = vld [vmem:[#allocation5 + $0x18] ss:$12 sps:$4 sm:$0xff]  }
  0x3d   :  { %v2230_v25 = vld [vmem:[#allocation5 + $0x19c] ss:$12 sps:$4 sm:$0xff]   ;;  %v2233_v27 = vld [vmem:[#allocation5 + $0x4] ss:$12 sps:$4 sm:$0xff]   ;;  %v2235_v30 = vld [vmem:[#allocation5] ss:$12 sps:$4 sm:$0xff]  }
  0x3e   :  { %1163 = vmatpush1.bf16.msra.mxu0 %v2205_v9  ;;  %v2232_v28 = vld [vmem:[#allocation5 + $0x198] ss:$12 sps:$4 sm:$0xff]   ;;  %v2238_v32 = vld [vmem:[#allocation5 + $0x180] ss:$12 sps:$4 sm:$0xff]   ;;  %v2241_v34 = vld [vmem:[#allocation5 + $0x168] ss:$12 sps:$4 sm:$0xff]  }
  0x3f   :  { %1164 = vmatprep.subr.bf16.mxu0 %v2209_v11  ;;  %1204 = vmatpush1.bf16.msra.mxu1 %v2208_v12  ;;  %v2236_v29 = vld [vmem:[#allocation5 + $0x184] ss:$12 sps:$4 sm:$0xff]   ;;  %v2239_v31 = vld [vmem:[#allocation5 + $0x16c] ss:$12 sps:$4 sm:$0xff]   ;;  %v2245_v35 = vld [vmem:[#allocation5 + $0x154] ss:$12 sps:$4 sm:$0xff]  }
  0x40   :  { %1205 = vmatprep.subr.bf16.mxu1 %v2212_v13  ;;  %v2242_v33 = vld [vmem:[#allocation5 + $0x2ec] ss:$12 sps:$4 sm:$0xff]   ;;  %v2244_v36 = vld [vmem:[#allocation5 + $0x2e8] ss:$12 sps:$4 sm:$0xff]   ;;  %v2247_v38 = vld [vmem:[#allocation5 + $0x150] ss:$12 sps:$4 sm:$0xff]  }
  0x41   :  { %v2248_v37 = vld [vmem:[#allocation5 + $0x2d4] ss:$12 sps:$4 sm:$0xff]   ;;  %v2251_v39 = vld [vmem:[#allocation5 + $0x13c] ss:$12 sps:$4 sm:$0xff]   ;;  %v2253_v42 = vld [vmem:[#allocation5 + $0x138] ss:$12 sps:$4 sm:$0xff]  }
  0x42   :  { %1165 = vmatpush1.bf16.msra.mxu0 %v2211_v14  ;;  %v2250_v40 = vld [vmem:[#allocation5 + $0x2d0] ss:$12 sps:$4 sm:$0xff]   ;;  %v2256_v44 = vld [vmem:[#allocation5 + $0x2b8] ss:$12 sps:$4 sm:$0xff]   ;;  %v2259_v47 = vld [vmem:[#allocation5 + $0x120] ss:$12 sps:$4 sm:$0xff]  }
  0x43   :  { %1166 = vmatprep.subr.bf16.mxu0 %v2215_v15  ;;  %1206 = vmatpush1.bf16.msra.mxu1 %v2214_v16  ;;  %v2254_v41 = vld [vmem:[#allocation5 + $0x2bc] ss:$12 sps:$4 sm:$0xff]   ;;  %v2257_v43 = vld [vmem:[#allocation5 + $0x124] ss:$12 sps:$4 sm:$0xff]   ;;  %v2263_v49 = vld [vmem:[#allocation5 + $0x10c] ss:$12 sps:$4 sm:$0xff]  }
  0x44   :  { %1207 = vmatprep.subr.bf16.mxu1 %v2218_v17  ;;  %v2260_v45 = vld [vmem:[#allocation5 + $0x2a4] ss:$12 sps:$4 sm:$0xff]   ;;  %v2262_v51 = vld [vmem:[#allocation5 + $0x2a0] ss:$12 sps:$4 sm:$0xff]   ;;  %v2265_v54 = vld [vmem:[#allocation5 + $0x108] ss:$12 sps:$4 sm:$0xff]  }
  0x45   :  { %v79_v46 = vld [vmem:[#allocation2 + $0x8] sm:$0xff]  ;;  %v81_v50 = vld [vmem:[#allocation2 + $0x18] sm:$0xff]  ;;  %v2266_v53 = vld [vmem:[#allocation5 + $0x28c] ss:$12 sps:$4 sm:$0xff]   ;;  %vm1154_vm0 = vcmask 130048   ;;  %vm2541_vm1 = vmmov 0  }
  0x46   :  { %1167 = vmatpush1.bf16.msra.mxu0 %v2217_v18  ;;  %v348_v48 = vpack.c.bf16 %v79_v46, %v79_v46  ;;  %v2590_v52 = vpack.c.bf16 %v81_v50, %v81_v50  ;;  %v2269_v55 = vld [vmem:[#allocation5 + $0xf4] ss:$12 sps:$4 sm:$0xff]   ;;  %v2271_v58 = vld [vmem:[#allocation5 + $0xf0] ss:$12 sps:$4 sm:$0xff]   ;;  %v2277_v62 = vld [vmem:[#allocation5 + $0xd8] ss:$12 sps:$4 sm:$0xff]  }
  0x47   :  { %1168 = vmatprep.subr.bf16.mxu0 %v2221_v19  ;;  %1208 = vmatpush1.bf16.msra.mxu1 %v2220_v20  ;;  %v2268_v56 = vld [vmem:[#allocation5 + $0x288] ss:$12 sps:$4 sm:$0xff]   ;;  %v2274_v60 = vld [vmem:[#allocation5 + $0x270] ss:$12 sps:$4 sm:$0xff]   ;;  %v2280_v63 = vld [vmem:[#allocation5 + $0x258] ss:$12 sps:$4 sm:$0xff]  }
  0x48   :  { %1209 = vmatprep.subr.bf16.mxu1 %v2224_v21  ;;  %1190 = vmatprep.mubr.bf16.mxu0 %v348_v48  ;;  %v2272_v57 = vld [vmem:[#allocation5 + $0x274] ss:$12 sps:$4 sm:$0xff]   ;;  %v2275_v59 = vld [vmem:[#allocation5 + $0xdc] ss:$12 sps:$4 sm:$0xff]   ;;  %v2281_v0 = vld [vmem:[#allocation5 + $0xc4] ss:$12 sps:$4 sm:$0xff]  }
  0x49   :  { %1231 = vmatprep.mubr.bf16.mxu1 %v2590_v52  ;;  %v2278_v61 = vld [vmem:[#allocation5 + $0x25c] ss:$12 sps:$4 sm:$0xff]   ;;  %v2283_v1 = vld [vmem:[#allocation5 + $0xc0] ss:$12 sps:$4 sm:$0xff]   ;;  %v2284_v2 = vld [vmem:[#allocation5 + $0x244] ss:$12 sps:$4 sm:$0xff]  }
  0x4a   :  { %1169 = vmatpush1.bf16.msra.mxu0 %v2223_v22  ;;  %v2286_v3 = vld [vmem:[#allocation5 + $0x240] ss:$12 sps:$4 sm:$0xff]   ;;  %v80_v6 = vld [vmem:[#allocation2 + $0x10] sm:$0xff]  ;;  %v2287_v9 = vld [vmem:[#allocation5 + $0x3a8] ss:$12 sps:$4 sm:$0xff]  }
  0x4b   :  { %1170 = vmatprep.subr.bf16.mxu0 %v2227_v23  ;;  %1210 = vmatpush1.bf16.msra.mxu1 %v2226_v24  ;;  %v78_v4 = vld [vmem:[#allocation2] sm:$0xff]  ;;  %v2293_v8 = vld [vmem:[#allocation5 + $0x170] ss:$12 sps:$4 sm:$0xff]   ;;  %v2595_v10 = vpack.c.bf16 %v80_v6, %v80_v6  ;;  %v2292_v11 = vld [vmem:[#allocation5 + $0x394] ss:$12 sps:$4 sm:$0xff]  }
  0x4c   :  { %1211 = vmatprep.subr.bf16.mxu1 %v2230_v25  ;;  %v2289_v5 = vld [vmem:[#allocation5 + $0x3ac] ss:$12 sps:$4 sm:$0xff]   ;;  %v2593_v7 = vpack.c.bf16 %v78_v4, %v78_v4  ;;  %v2294_v12 = vld [vmem:[#allocation5 + $0xb0] ss:$12 sps:$4 sm:$0xff]   ;;  %v2308_v21 = vld [vmem:[#allocation5 + $0x128] ss:$12 sps:$4 sm:$0xff]  }
  0x4d   :  { %v2298_v13 = vld [vmem:[#allocation5 + $0x158] ss:$12 sps:$4 sm:$0xff]   ;;  %v2290_v14 = vld [vmem:[#allocation5 + $0x390] ss:$12 sps:$4 sm:$0xff]   ;;  %v2303_v17 = vld [vmem:[#allocation5 + $0x140] ss:$12 sps:$4 sm:$0xff]  }
  0x4e   :  { %1171 = vmatpush1.bf16.msra.mxu0 %v2229_v26  ;;  %v2297_v15 = vld [vmem:[#allocation5 + $0x37c] ss:$12 sps:$4 sm:$0xff]   ;;  %v2299_v16 = vld [vmem:[#allocation5 + $0x98] ss:$12 sps:$4 sm:$0xff]   ;;  %v2304_v20 = vld [vmem:[#allocation5 + $0x80] ss:$12 sps:$4 sm:$0xff]  }
  0x4f   :  { %1172 = vmatprep.subr.bf16.mxu0 %v2233_v27  ;;  %1212 = vmatpush1.bf16.msra.mxu1 %v2232_v28  ;;  %v2295_v18 = vld [vmem:[#allocation5 + $0x378] ss:$12 sps:$4 sm:$0xff]   ;;  %v2300_v22 = vld [vmem:[#allocation5 + $0x360] ss:$12 sps:$4 sm:$0xff]   ;;  %v2309_v24 = vld [vmem:[#allocation5 + $0x68] ss:$12 sps:$4 sm:$0xff]  }
  0x50   :  { %1213 = vmatprep.subr.bf16.mxu1 %v2236_v29  ;;  %v2302_v19 = vld [vmem:[#allocation5 + $0x364] ss:$12 sps:$4 sm:$0xff]   ;;  %v2307_v23 = vld [vmem:[#allocation5 + $0x34c] ss:$12 sps:$4 sm:$0xff]   ;;  %v2305_v26 = vld [vmem:[#allocation5 + $0x348] ss:$12 sps:$4 sm:$0xff]  }
  0x51   :  { %v2313_v25 = vld [vmem:[#allocation5 + $0x110] ss:$12 sps:$4 sm:$0xff]   ;;  %v2312_v27 = vld [vmem:[#allocation5 + $0x334] ss:$12 sps:$4 sm:$0xff]   ;;  %v2318_v29 = vld [vmem:[#allocation5 + $0xf8] ss:$12 sps:$4 sm:$0xff]  }
  0x52   :  { %1173 = vmatpush1.bf16.msra.mxu0 %v2235_v30  ;;  %v2314_v28 = vld [vmem:[#allocation5 + $0x50] ss:$12 sps:$4 sm:$0xff]   ;;  %v2339_v50 = vld [vmem:[#allocation5 + $0x218] ss:$12 sps:$4 sm:$0xff]   ;;  %v2364_v6 = vld [vmem:[#allocation5 + $0x1a0] ss:$12 sps:$4 sm:$0xff]  }
  0x53   :  { %1174 = vmatprep.subr.bf16.mxu0 %v2239_v31  ;;  %1214 = vmatpush1.bf16.msra.mxu1 %v2238_v32  ;;  %v2310_v30 = vld [vmem:[#allocation5 + $0x330] ss:$12 sps:$4 sm:$0xff]   ;;  %v2319_v32 = vld [vmem:[#allocation5 + $0x38] ss:$12 sps:$4 sm:$0xff]  }
  0x54   :  { %1215 = vmatprep.subr.bf16.mxu1 %v2242_v33  ;;  %v2317_v31 = vld [vmem:[#allocation5 + $0x31c] ss:$12 sps:$4 sm:$0xff]   ;;  %v2323_v33 = vld [vmem:[#allocation5 + $0xe0] ss:$12 sps:$4 sm:$0xff]   ;;  %v2355_v4 = vld [vmem:[#allocation5 + $0x3d8] ss:$12 sps:$4 sm:$0xff]  }
  0x55   :  { %v2334_v46 = vld [vmem:[#allocation5 + $0x230] ss:$12 sps:$4 sm:$0xff]  }
  0x56   :  { %1175 = vmatpush2.bf16.msra.mxu0 %v2241_v34  ;;  %v2315_v34 = vld [vmem:[#allocation5 + $0x318] ss:$12 sps:$4 sm:$0xff]  }
  0x57   :  { %1176 = vmatprep.subr.bf16.mxu0 %v2245_v35  ;;  %1216 = vmatpush2.bf16.msra.mxu1 %v2244_v36  ;;  %v2322_v35 = vld [vmem:[#allocation5 + $0x304] ss:$12 sps:$4 sm:$0xff]   ;;  %v2324_v36 = vld [vmem:[#allocation5 + $0x20] ss:$12 sps:$4 sm:$0xff]  }
  0x58   :  { %1217 = vmatprep.subr.bf16.mxu1 %v2248_v37  ;;  %v2328_v37 = vld [vmem:[#allocation5 + $0xc8] ss:$12 sps:$4 sm:$0xff]  }
  0x5a   :  { %1177 = vmatpush2.bf16.msra.mxu0 %v2247_v38  ;;  %v2320_v38 = vld [vmem:[#allocation5 + $0x300] ss:$12 sps:$4 sm:$0xff]  }
  0x5b   :  { %1178 = vmatprep.subr.bf16.mxu0 %v2251_v39  ;;  %1218 = vmatpush2.bf16.msra.mxu1 %v2250_v40  ;;  %v2327_v39 = vld [vmem:[#allocation5 + $0x46c] ss:$12 sps:$4 sm:$0xff]   ;;  %v2329_v40 = vld [vmem:[#allocation5 + $0x8] ss:$12 sps:$4 sm:$0xff]  }
  0x5c   :  { %1219 = vmatprep.subr.bf16.mxu1 %v2254_v41  ;;  %v2333_v41 = vld [vmem:[#allocation5 + $0x2f0] ss:$12 sps:$4 sm:$0xff]  }
  0x5e   :  { %1179 = vmatpush2.bf16.msra.mxu0 %v2253_v42  ;;  %v83_v42 = vld [vmem:[#allocation2 + $0x28] sm:$0xff] }
  0x5f   :  { %1180 = vmatprep.subr.bf16.mxu0 %v2257_v43  ;;  %1220 = vmatpush2.bf16.msra.mxu1 %v2256_v44  ;;  %v2325_v43 = vld [vmem:[#allocation5 + $0x468] ss:$12 sps:$4 sm:$0xff]   ;;  %v2599_v44 = vpack.c.bf16 %v83_v42, %v83_v42  ;;  %v2394_v42 = vld [vmem:[#allocation7 + $0x20] sm:$0xff]  }
  0x60   :  { %1221 = vmatprep.subr.bf16.mxu1 %v2260_v45  ;;  %v2332_v45 = vld [vmem:[#allocation5 + $0x454] ss:$12 sps:$4 sm:$0xff]  }
  0x62   :  { %1181 = vmatpush2.bf16.msra.mxu0 %v2259_v47  ;;  %v2338_v47 = vld [vmem:[#allocation5 + $0x2d8] ss:$12 sps:$4 sm:$0xff]  }
  0x63   :  { %1182 = vmatprep.subr.bf16.mxu0 %v2263_v49  ;;  %1222 = vmatpush2.bf16.msra.mxu1 %v2262_v51  ;;  %v2337_v49 = vld [vmem:[#allocation5 + $0x43c] ss:$12 sps:$4 sm:$0xff]   ;;  %v2343_v51 = vld [vmem:[#allocation5 + $0x2c0] ss:$12 sps:$4 sm:$0xff]  }
  0x64   :  { %1223 = vmatprep.subr.bf16.mxu1 %v2266_v53  ;;  %v2335_v53 = vld [vmem:[#allocation5 + $0x438] ss:$12 sps:$4 sm:$0xff]  }
  0x66   :  { %1183 = vmatpush2.bf16.msra.mxu0 %v2265_v54  ;;  %v2342_v54 = vld [vmem:[#allocation5 + $0x424] ss:$12 sps:$4 sm:$0xff]  }
  0x67   :  { %1184 = vmatprep.subr.bf16.mxu0 %v2269_v55  ;;  %1224 = vmatpush2.bf16.msra.mxu1 %v2268_v56  ;;  %v2344_v55 = vld [vmem:[#allocation5 + $0x200] ss:$12 sps:$4 sm:$0xff]   ;;  %v2348_v56 = vld [vmem:[#allocation5 + $0x2a8] ss:$12 sps:$4 sm:$0xff]  }
  0x68   :  { %1225 = vmatprep.subr.bf16.mxu1 %v2272_v57  ;;  %v2340_v57 = vld [vmem:[#allocation5 + $0x420] ss:$12 sps:$4 sm:$0xff]  }
  0x6a   :  { %1185 = vmatpush2.bf16.msra.mxu0 %v2271_v58  ;;  %v2347_v58 = vld [vmem:[#allocation5 + $0x40c] ss:$12 sps:$4 sm:$0xff]  }
  0x6b   :  { %1186 = vmatprep.subr.bf16.mxu0 %v2275_v59  ;;  %1226 = vmatpush2.bf16.msra.mxu1 %v2274_v60  ;;  %v2349_v59 = vld [vmem:[#allocation5 + $0x1e8] ss:$12 sps:$4 sm:$0xff]   ;;  %v2353_v60 = vld [vmem:[#allocation5 + $0x290] ss:$12 sps:$4 sm:$0xff]  }
  0x6c   :  { %1227 = vmatprep.subr.bf16.mxu1 %v2278_v61  ;;  %v2352_v61 = vld [vmem:[#allocation5 + $0x3f4] ss:$12 sps:$4 sm:$0xff]  }
  0x6e   :  { %1187 = vmatpush2.bf16.msra.mxu0 %v2277_v62  ;;  %v2350_v62 = vld [vmem:[#allocation5 + $0x3f0] ss:$12 sps:$4 sm:$0xff]  }
  0x6f   :  { %1188 = vmatprep.subr.bf16.mxu0 %v2281_v0  ;;  %1228 = vmatpush2.bf16.msra.mxu1 %v2280_v63  ;;  %v2354_v63 = vld [vmem:[#allocation5 + $0x1d0] ss:$12 sps:$4 sm:$0xff]   ;;  %v2358_v0 = vld [vmem:[#allocation5 + $0x278] ss:$12 sps:$4 sm:$0xff]  }
  0x70   :  { %1229 = vmatprep.subr.bf16.mxu1 %v2284_v2  ;;  %v2359_v2 = vld [vmem:[#allocation5 + $0x1b8] ss:$12 sps:$4 sm:$0xff]  }
  0x72   :  { %1189 = vmatpush2.bf16.msra.mxu0 %v2283_v1  ;;  %v2357_v1 = vld [vmem:[#allocation5 + $0x3dc] ss:$12 sps:$4 sm:$0xff]  }
  0x73   :  { %1240 = vmatprep.subr.bf16.mxu0 %v2289_v5  ;;  %1230 = vmatpush2.bf16.msra.mxu1 %v2286_v3  ;;  %v2363_v3 = vld [vmem:[#allocation5 + $0x260] ss:$12 sps:$4 sm:$0xff]   ;;  %v2362_v5 = vld [vmem:[#allocation5 + $0x3c4] ss:$12 sps:$4 sm:$0xff]  }
  0x74   :  { %2025 = vmatprep.subr.bf16.mxu1 %v2293_v8  ;;  %v2360_v8 = vld [vmem:[#allocation5 + $0x3c0] ss:$12 sps:$4 sm:$0xff]  }
  0x75   :  { %1191 = vmatmul.mubr.bf16.vlgmr.msra.gmra.mxu0 %v2593_v7 }
  0x76   :  { %1241 = vmatpush1.bf16.msra.mxu0 %v2287_v9  ;;  %1232 = vmatmul.mubr.bf16.vlgmr.msra.gmra.mxu1 %v2595_v10  ;;  %v82_v9 = vld [vmem:[#allocation2 + $0x20] sm:$0xff] }
  0x77   :  { %1242 = vmatprep.subr.bf16.mxu0 %v2292_v11  ;;  %2026 = vmatpush3.bf16.msra.mxu1 %v2294_v12  ;;  %v2367_v11 = vld [vmem:[#allocation5 + $0x484] ss:$12 sps:$4 sm:$0xff]   ;;  %v2369_v12 = vld [vmem:[#allocation5 + $0x188] ss:$12 sps:$4 sm:$0xff]  }
  0x78   :  { %1354 = vmatprep.mubr.bf16.mxu1 %v348_v48  ;;  %2027 = vmatprep.subr.bf16.mxu1 %v2298_v13  ;;  %v2330_v48 = vld [vmem:[#allocation5 + $0x450] ss:$12 sps:$4 sm:$0xff]   ;;  %v2365_v13 = vld [vmem:[#allocation5 + $0x480] ss:$12 sps:$4 sm:$0xff]  }
  0x79   :  { %1272 = vmatprep.mubr.bf16.mxu0 %v2599_v44 }
  0x7a   :  { %1243 = vmatpush1.bf16.msra.mxu0 %v2290_v14  ;;  %v2604_v14 = vpack.c.bf16 %v82_v9, %v82_v9 }
  0x7b   :  { %1244 = vmatprep.subr.bf16.mxu0 %v2297_v15  ;;  %2028 = vmatpush3.bf16.msra.mxu1 %v2299_v16  ;;  %v2370_v15 = vld [vmem:[#allocation5 + $0x470] ss:$12 sps:$4 sm:$0xff]   ;;  %v2386_v16 = vld [vmem:[#allocation5 + $0x488] ss:$12 sps:$4 sm:$0xff]  }
  0x7c   :  { %2029 = vmatprep.subr.bf16.mxu1 %v2303_v17  ;;  %v84_v17 = vld [vmem:[#allocation2 + $0x30] sm:$0xff] }
  0x7e   :  { %1245 = vmatpush1.bf16.msra.mxu0 %v2295_v18  ;;  %v2539_v18 = vmov 0.0  }
  0x7f   :  { %1246 = vmatprep.subr.bf16.mxu0 %v2302_v19  ;;  %2030 = vmatpush3.bf16.msra.mxu1 %v2304_v20  ;;  %v2540_v19 = vmov 0   ;;  %v2371_v20 = vld [vmem:[#allocation5 + $0x3b0] ss:$12 sps:$4 sm:$0xff]  }
  0x80   :  { %2031 = vmatprep.subr.bf16.mxu1 %v2308_v21  ;;  %v353_v21 = vpack.c.bf16 %v84_v17, %v84_v17 }
  0x82   :  { %1247 = vmatpush1.bf16.msra.mxu0 %v2300_v22  ;;  %v2372_v22 = vld [vmem:[#allocation5 + $0x458] ss:$12 sps:$4 sm:$0xff]  }
  0x83   :  { %1248 = vmatprep.subr.bf16.mxu0 %v2307_v23  ;;  %2032 = vmatpush3.bf16.msra.mxu1 %v2309_v24  ;;  %v2387_v23 = vld [vmem:[#allocation7 + $0x78] sm:$0xff]  }
  0x84   :  { %2033 = vmatprep.subr.bf16.mxu1 %v2313_v25  ;;  %v2388_v24 = vld [vmem:[#allocation7 + $0x38] sm:$0xff]   ;;  %v2373_v25 = vld [vmem:[#allocation5 + $0x398] ss:$12 sps:$4 sm:$0xff]  }
  0x86   :  { %1249 = vmatpush1.bf16.msra.mxu0 %v2305_v26  ;;  %v2389_v26 = vld [vmem:[#allocation7 + $0x70] sm:$0xff]  }
  0x87   :  { %1250 = vmatprep.subr.bf16.mxu0 %v2312_v27  ;;  %2034 = vmatpush3.bf16.msra.mxu1 %v2314_v28  ;;  %v2390_v27 = vld [vmem:[#allocation7 + $0x30] sm:$0xff]  }
  0x88   :  { %2035 = vmatprep.subr.bf16.mxu1 %v2318_v29  ;;  %v2375_v28 = vld [vmem:[#allocation5 + $0x380] ss:$12 sps:$4 sm:$0xff]  }
  0x89   :  { %v2391_v29 = vld [vmem:[#allocation7 + $0x68] sm:$0xff]  }
  0x8a   :  { %1251 = vmatpush1.bf16.msra.mxu0 %v2310_v30  ;;  %v2376_v30 = vld [vmem:[#allocation5 + $0x428] ss:$12 sps:$4 sm:$0xff]  }
  0x8b   :  { %1252 = vmatprep.subr.bf16.mxu0 %v2317_v31  ;;  %2036 = vmatpush3.bf16.msra.mxu1 %v2319_v32  ;;  %v2392_v31 = vld [vmem:[#allocation7 + $0x28] sm:$0xff]   ;;  %v2377_v32 = vld [vmem:[#allocation5 + $0x368] ss:$12 sps:$4 sm:$0xff]  }
  0x8c   :  { %2037 = vmatprep.subr.bf16.mxu1 %v2323_v33  ;;  %v2378_v33 = vld [vmem:[#allocation5 + $0x410] ss:$12 sps:$4 sm:$0xff]  }
  0x8e   :  { %1253 = vmatpush1.bf16.msra.mxu0 %v2315_v34  ;;  %v2379_v34 = vld [vmem:[#allocation5 + $0x350] ss:$12 sps:$4 sm:$0xff]  }
  0x8f   :  { %1254 = vmatprep.subr.bf16.mxu0 %v2322_v35  ;;  %2038 = vmatpush3.bf16.msra.mxu1 %v2324_v36  ;;  %v2380_v35 = vld [vmem:[#allocation5 + $0x3f8] ss:$12 sps:$4 sm:$0xff]  }
  0x90   :  { %2039 = vmatprep.subr.bf16.mxu1 %v2328_v37  ;;  %v2381_v36 = vld [vmem:[#allocation5 + $0x338] ss:$12 sps:$4 sm:$0xff]   ;;  %v2382_v37 = vld [vmem:[#allocation5 + $0x3e0] ss:$12 sps:$4 sm:$0xff]  }
  0x92   :  { %1255 = vmatpush1.bf16.msra.mxu0 %v2320_v38  ;;  %v2383_v38 = vld [vmem:[#allocation5 + $0x320] ss:$12 sps:$4 sm:$0xff]  }
  0x93   :  { %1256 = vmatprep.subr.bf16.mxu0 %v2327_v39  ;;  %2040 = vmatpush3.bf16.msra.mxu1 %v2329_v40  ;;  %v2384_v39 = vld [vmem:[#allocation5 + $0x3c8] ss:$12 sps:$4 sm:$0xff]  }
  0x94   :  { %2047 = vmatprep.subr.bf16.mxu1 %v2333_v41  ;;  %v2385_v40 = vld [vmem:[#allocation5 + $0x308] ss:$12 sps:$4 sm:$0xff]   ;;  %v2393_v41 = vld [vmem:[#allocation7 + $0x60] sm:$0xff]  }
  0x96   :  { %1257 = vmatpush2.bf16.msra.mxu0 %v2325_v43  ;;  %1355 = vmatmul.mubr.bf16.vlgmr.msra.gmra.mxu1 %v2593_v7  ;;  %v2368_v7 = vld [vmem:[#allocation5 + $0x248] ss:$12 sps:$4 sm:$0xff]  }
  0x97   :  { %1258 = vmatprep.subr.bf16.mxu0 %v2332_v45  ;;  %2048 = vmatpush3.bf16.msra.mxu1 %v2334_v46  ;;  %v2395_v43 = vld [vmem:[#allocation7 + $0x58] sm:$0xff]   ;;  %v2397_v45 = vld [vmem:[#allocation7 + $0x50] sm:$0xff]  }
  0x98   :  { %1394 = vmatprep.mubr.bf16.mxu1 %v2590_v52  ;;  %2049 = vmatprep.subr.bf16.mxu1 %v2338_v47  ;;  %v2345_v52 = vld [vmem:[#allocation5 + $0x408] ss:$12 sps:$4 sm:$0xff]   ;;  %v2399_v47 = vld [vmem:[#allocation7 + $0x48] sm:$0xff]  }
  0x99   :  { %v2398_v46 = vld [vmem:[#allocation7 + $0x10] sm:$0xff]  }
  0x9a   :  { %1259 = vmatpush2.bf16.msra.mxu0 %v2330_v48  ;;  %v2400_v48 = vld [vmem:[#allocation7 + $0x8] sm:$0xff]  }
  0x9b   :  { %1260 = vmatprep.subr.bf16.mxu0 %v2337_v49  ;;  %2050 = vmatpush3.bf16.msra.mxu1 %v2339_v50  ;;  %v2401_v49 = vld [vmem:[#allocation7 + $0x40] sm:$0xff]  }
  0x9c   :  { %2051 = vmatprep.subr.bf16.mxu1 %v2343_v51  ;;  %v2402_v50 = vld [vmem:[#allocation7] sm:$0xff]   ;;  %v2403_v51 = vld [vmem:[#allocation7 + $0xb8] sm:$0xff]  }
  0x9e   :  { %1261 = vmatpush2.bf16.msra.mxu0 %v2335_v53  ;;  %v2404_v53 = vld [vmem:[#allocation7 + $0xb0] sm:$0xff]  }
  0x9f   :  { %1262 = vmatprep.subr.bf16.mxu0 %v2342_v54  ;;  %2052 = vmatpush3.bf16.msra.mxu1 %v2344_v55  ;;  %v2405_v54 = vld [vmem:[#allocation7 + $0xa8] sm:$0xff]   ;;  %v2406_v55 = vld [vmem:[#allocation7 + $0xa0] sm:$0xff]  }
  0xa0   :  { %2053 = vmatprep.subr.bf16.mxu1 %v2348_v56  ;;  %v2407_v56 = vld [vmem:[#allocation7 + $0x98] sm:$0xff]  }
  0xa2   :  { %1263 = vmatpush2.bf16.msra.mxu0 %v2340_v57  ;;  %v2408_v57 = vld [vmem:[#allocation7 + $0x90] sm:$0xff]  }
  0xa3   :  { %1264 = vmatprep.subr.bf16.mxu0 %v2347_v58  ;;  %2054 = vmatpush3.bf16.msra.mxu1 %v2349_v59  ;;  %v2409_v58 = vld [vmem:[#allocation7 + $0x88] sm:$0xff]   ;;  %v2410_v59 = vld [vmem:[#allocation7 + $0x80] sm:$0xff]  }
  0xa4   :  { %2055 = vmatprep.subr.bf16.mxu1 %v2353_v60  ;;  %v355_v60 = vlaneseq }
  0xa6   :  { %1265 = vmatpush2.bf16.msra.mxu0 %v2345_v52  ;;  %v356_v52 = vshrl.u32 %v355_v60, 7  ;;  %v2412_v60 = vld [vmem:[#allocation8 + $0x30] sm:$0xff]  }
  0xa7   :  { %1266 = vmatprep.subr.bf16.mxu0 %v2352_v61  ;;  %2056 = vmatpush3.bf16.msra.mxu1 %v2354_v63 }
  0xa8   :  { %2057 = vmatprep.subr.bf16.mxu1 %v2358_v0  ;;  %v357_v61 = vsub.s32 0, %v356_v52  ;;  %v361_v63 = vsub.s32 1, %v356_v52 }
  0xaa   :  { %1267 = vmatpush2.bf16.msra.mxu0 %v2350_v62  ;;  %v281_v62 = vld [vmem:[%s2646_s2] sm:$0x7] }
  0xab   :  { %1268 = vmatprep.subr.bf16.mxu0 %v2357_v1  ;;  %2058 = vmatpush3.bf16.msra.mxu1 %v2359_v2  ;;  %v358_v0 = vrot.slane %v281_v62, %v357_v61  ;;  %v362_v1 = vrot.slane %v281_v62, %v361_v63  ;;  %v2414_v61 = vld [vmem:[#allocation8 + $0x20] sm:$0xff]   ;;  %v2416_v63 = vld [vmem:[#allocation8 + $0x10] sm:$0xff]  }
  0xac   :  { %2059 = vmatprep.subr.bf16.mxu1 %v2363_v3 }
  0xae   :  { %1269 = vmatpush2.bf16.msra.mxu0 %v2355_v4 }
  0xaf   :  { %1270 = vmatprep.subr.bf16.mxu0 %v2362_v5  ;;  %2060 = vmatpush3.bf16.msra.mxu1 %v2364_v6 }
  0xb0   :  { %2061 = vmatprep.subr.bf16.mxu1 %v2368_v7 }
  0xb2   :  { %1271 = vmatpush2.bf16.msra.mxu0 %v2360_v8 }
  0xb3   :  { %1295 = vmatprep.subr.bf16.mxu0 %v2367_v11  ;;  %2062 = vmatpush3.bf16.msra.mxu1 %v2369_v12 }
  0xb4   :  { %2133 = vmatprep.subr.bf16.mxu1 %v2539_v18 }
  0xb5   :  { %1273 = vmatmul.mubr.bf16.vlgmr.msra.gmra.mxu0 %v2604_v14 }
  0xb6   :  { %1296 = vmatpush1.bf16.msra.mxu0 %v2365_v13  ;;  %1313 = vmatprep.mubr.bf16.mxu0 %v2540_v19 }
  0xb7   :  { %1395 = vmatmul.mubr.bf16.vlgmr.msra.gmra.mxu1 %v2595_v10  ;;  %2069 = vmatprep.subr.bf16.mxu0 %v2370_v15  ;;  %v2374_v10 = vld [vmem:[#allocation5 + $0x440] ss:$12 sps:$4 sm:$0xff]  }
  0xb8   :  { %2134 = vmatpush3.bf16.msra.mxu1 %v2386_v16  ;;  %2135 = vmatprep.mubr.msk.bf16.mxu1 %vm2541_vm1, %v2539_v18 }
  0xb9   :  { %2093 = vmatprep.subr.bf16.mxu1 %v2387_v23 }
  0xbd   :  { %1990 = vmatmul.mubr.msk.bf16.vlgmr.msra.gmra.mxu0 %vm1154_vm0, %v353_v21 }
  0xbe   :  { %2070 = vmatpush3.bf16.msra.mxu0 %v2371_v20  ;;  %1434 = vmatprep.mubr.bf16.mxu0 %v2599_v44  ;;  %v2396_v44 = vld [vmem:[#allocation7 + $0x18] sm:$0xff]  }
  0xbf   :  { %2071 = vmatprep.subr.bf16.mxu0 %v2372_v22  ;;  %2136 = vmatmul.mubr.msk.bf16.vlgmr.msra.gmra.mxu1 %vm1154_vm0, %v353_v21 }
  0xc0   :  { %2094 = vmatpush3.bf16.msra.mxu1 %v2388_v24 }
  0xc1   :  { %2095 = vmatprep.subr.bf16.mxu1 %v2389_v26 }
  0xc2   :  { %2072 = vmatpush3.bf16.msra.mxu0 %v2373_v25 }
  0xc3   :  { %2073 = vmatprep.subr.bf16.mxu0 %v2374_v10 }
  0xc4   :  { %2096 = vmatpush3.bf16.msra.mxu1 %v2390_v27 }
  0xc5   :  { %2097 = vmatprep.subr.bf16.mxu1 %v2391_v29 }
  0xc6   :  { %2074 = vmatpush3.bf16.msra.mxu0 %v2375_v28 }
  0xc7   :  { %2075 = vmatprep.subr.bf16.mxu0 %v2376_v30 }
  0xc8   :  { %2098 = vmatpush3.bf16.msra.mxu1 %v2392_v31 }
  0xc9   :  { %2099 = vmatprep.subr.bf16.mxu1 %v2393_v41 }
  0xca   :  { %2076 = vmatpush3.bf16.msra.mxu0 %v2377_v32 }
  0xcb   :  { %2077 = vmatprep.subr.bf16.mxu0 %v2378_v33 }
  0xcc   :  { %2100 = vmatpush3.bf16.msra.mxu1 %v2394_v42 }
  0xcd   :  { %2101 = vmatprep.subr.bf16.mxu1 %v2395_v43 }
  0xce   :  { %2078 = vmatpush3.bf16.msra.mxu0 %v2379_v34 }
  0xcf   :  { %2079 = vmatprep.subr.bf16.mxu0 %v2380_v35 }
  0xd0   :  { %2102 = vmatpush3.bf16.msra.mxu1 %v2396_v44  ;;  %v365_v44 = vsub.s32 2, %v356_v52  ;;  %v2413_v52 = vld [vmem:[#allocation8 + $0x28] sm:$0xff]  }
  0xd1   :  { %2103 = vmatprep.subr.bf16.mxu1 %v2397_v45 }
  0xd2   :  { %2080 = vmatpush3.bf16.msra.mxu0 %v2381_v36  ;;  %v366_v45 = vrot.slane %v281_v62, %v365_v44  ;;  %v2415_v62 = vld [vmem:[#allocation8 + $0x18] sm:$0xff]  }
  0xd3   :  { %2081 = vmatprep.subr.bf16.mxu0 %v2382_v37 }
  0xd4   :  { %2104 = vmatpush3.bf16.msra.mxu1 %v2398_v46 }
  0xd5   :  { %2105 = vmatprep.subr.bf16.mxu1 %v2399_v47 }
  0xd6   :  { %2082 = vmatpush3.bf16.msra.mxu0 %v2383_v38 }
  0xd7   :  { %2083 = vmatprep.subr.bf16.mxu0 %v2384_v39 }
  0xd8   :  { %2106 = vmatpush3.bf16.msra.mxu1 %v2400_v48 }
  0xd9   :  { %2107 = vmatprep.subr.bf16.mxu1 %v2401_v49 }
  0xda   :  { %2084 = vmatpush3.bf16.msra.mxu0 %v2385_v40 }
  0xdb   :  { %2139 = vmatprep.subr.bf16.mxu0 %v2539_v18 }
  0xdc   :  { %2108 = vmatpush3.bf16.msra.mxu1 %v2402_v50 }
  0xdd   :  { %1435 = vmatmul.mubr.bf16.vlgmr.msra.gmra.mxu0 %v2604_v14  ;;  %2159 = vmatprep.subr.bf16.mxu1 %v2539_v18 }
  0xde   :  { %2155 = vmatprep.mubr.msk.bf16.mxu0 %vm2541_vm1, %v2539_v18  ;;  %2140 = vmatpush3.bf16.msra.mxu0 %v2403_v51 }
  0xdf   :  { %2141 = vmatprep.subr.bf16.mxu0 %v2539_v18 }
  0xe2   :  { %2142 = vmatpush3.bf16.msra.mxu0 %v2404_v53 }
  0xe3   :  { %2143 = vmatprep.subr.bf16.mxu0 %v2539_v18 }
  0xe6   :  { %2144 = vmatpush3.bf16.msra.mxu0 %v2405_v54 }
  0xe7   :  { %2145 = vmatprep.subr.bf16.mxu0 %v2539_v18 }
  0xea   :  { %2146 = vmatpush3.bf16.msra.mxu0 %v2406_v55 }
  0xeb   :  { %2147 = vmatprep.subr.bf16.mxu0 %v2539_v18 }
  0xee   :  { %2148 = vmatpush3.bf16.msra.mxu0 %v2407_v56 }
  0xef   :  { %2149 = vmatprep.subr.bf16.mxu0 %v2539_v18 }
  0xf2   :  { %2150 = vmatpush3.bf16.msra.mxu0 %v2408_v57 }
  0xf3   :  { %2151 = vmatprep.subr.bf16.mxu0 %v2539_v18 }
  0xf6   :  { %2152 = vmatpush3.bf16.msra.mxu0 %v2409_v58 }
  0xf7   :  { %2153 = vmatprep.subr.bf16.mxu0 %v2539_v18 }
  0xfa   :  { %2154 = vmatpush3.bf16.msra.mxu0 %v2410_v59  ;;  %v2411_v59 = vld [vmem:[#allocation8 + $0x38] sm:$0xff]  }
 0x135   :  { %v1192_v2 = vpop.f32.mrf.mxu0 }
 0x136   :  { %v1193_v3 = vadd.f32 %v1192_v2, %v358_v0  ;;  %v1233_v5 = vpop.f32.mrf.mxu1  ;;  %v2417_v0 = vld [vmem:[#allocation8 + $0x8] sm:$0xff]  }
 0x137   :  { %v1194_v4 = vpop.f32.mrf.mxu0 }
 0x138   :  { %v1195_v6 = vadd.f32 %v1194_v4, %v362_v1  ;;  %v1234_v7 = vadd.f32 %v1233_v5, %v1193_v3  ;;  %v1235_v9 = vpop.f32.mrf.mxu1  ;;  %v2418_v1 = vld [vmem:[#allocation8] sm:$0xff]  }
 0x139   :  { %v1196_v8 = vpop.f32.mrf.mxu0 }
 0x13a   :  { %v1236_v11 = vadd.f32 %v1235_v9, %v1195_v6  ;;  %v1237_v13 = vpop.f32.mrf.mxu1 }
 0x13b   :  { %v1197_v12 = vpop.f32.mrf.mxu0 }
 0x13c   :  { %v1238_v14 = vpop.f32.mrf.mxu1 }
 0x156   :  { %v2041_v15 = vpop.f32.mrf.mxu1 }
 0x158   :  { %v2042_v16 = vpop.f32.mrf.mxu1 }
 0x159   :  { %v2043_v17 = vadd.f32 %v2042_v16, %v2041_v15 }
 0x15a   :  { %v2044_v19 = vpop.f32.mrf.mxu1 }
 0x15b   :  { %v1357_v46 = vadd.f32 %v2043_v17, %v366_v45 }
 0x15c   :  { %v2045_v20 = vpop.f32.mrf.mxu1 }
 0x175   :  { %v1274_v21 = vpop.f32.mrf.mxu0 }
 0x176   :  { %v1275_v27 = vadd.f32 %v1274_v21, %v1234_v7  ;;  %v1992_v7 = vld [vmem:[%s2648_s4] ss:$0 sm:$0xff]  ;;  %s2542_s4 = smov [#allocation10]  }
 0x177   :  { %v1276_v22 = vpop.f32.mrf.mxu0  ;;  %v2063_v23 = vpop.f32.mrf.mxu1  ;;  %s1832_s20 = sshll.u32 %s2542_s4, 4  ;;  %s1833_s20 = int_to_ptr.vmem [resolvable:$true] %s1832_s20 }
 0x178   :  { %v1277_v30 = vadd.f32 %v1276_v22, %v1236_v11  ;;  %s2503_s21 = scalar_lea.vmem %s1833_s20, 128  ;;  %p2508_p7 = scmp.lt.s32.totalorder %s1833_s20, %s1833_s20 }
 0x179   :  { %v1278_v24 = vpop.f32.mrf.mxu0  ;;  %v2064_v25 = vpop.f32.mrf.mxu1  ;;  %p2504_p6 = scmp.ne.s32.totalorder %s1833_s20, %s2503_s21  ;;  %p2509_p8 = scmp.lt.s32.totalorder %s2503_s21, %s2503_s21 }
 0x17a   :  { %v2065_v47 = vadd.f32 %v2064_v25, %v2063_v23 }
 0x17b   :  { %v1279_v26 = vpop.f32.mrf.mxu0  ;;  %v2066_v10 = vpop.f32.mrf.mxu1  ;;  %p2510_p9 = por %p2509_p8, %p2508_p7 }
 0x17c   :  { %v1397_v50 = vadd.f32 %v2065_v47, %v1357_v46 }
 0x17d   :  { %v1315_v28 = vpop.f32.mrf.mxu0  ;;  %v2067_v29 = vpop.f32.mrf.mxu1  ;;  %p2511_p10 = pnand %p2510_p9, %p2504_p6 }
 0x17e   :  { %v1316_v31 = vadd.f32 %v1315_v28, %v1275_v27 }
 0x17f   :  { %v1317_v32 = vpop.f32.mrf.mxu0  ;;  %v1476_v33 = vpop.f32.mrf.mxu1 }
 0x180   :  { %v1318_v34 = vadd.f32 %v1317_v32, %v1277_v30  ;;  %v1482_v35 = vmax.f32 %v1316_v31, 0.0 }
 0x181   :  { %v1319_v36 = vpop.f32.mrf.mxu0  ;;  %v2137_v37 = vpop.f32.mrf.mxu1 }
 0x182   :  { %v1483_v38 = vmax.f32 %v1318_v34, 0.0  ;;  %v1485_v42 = vpack.c.bf16 %v1482_v35, %v1482_v35 }
 0x183   :  { %v1320_v39 = vpop.f32.mrf.mxu0  ;;  %v1479_v40 = vpop.f32.mrf.mxu1 }
 0x184   :  { %v1486_v41 = vpack.c.bf16 %v1483_v38, %v1483_v38 }
 0x185   :  { %v2138_v43 = vpop.f32.mrf.mxu1 }
 0x186   :  { %1670 = vmatprep.mubr.bf16.mxu1 %v1486_v41 }
 0x187   :  { %1671 = vmatmul.mubr.bf16.vlgmr.msra.gmra.mxu1 %v1485_v42 }
 0x188   :  { %2175 = vmatprep.mubr.msk.bf16.mxu1 %vm2541_vm1, %v2539_v18  ;;  %2160 = vmatpush3.bf16.msra.mxu1 %v2411_v59 }
 0x189   :  { %2161 = vmatprep.subr.bf16.mxu1 %v2539_v18 }
 0x18c   :  { %2162 = vmatpush3.bf16.msra.mxu1 %v2412_v60 }
 0x18d   :  { %2163 = vmatprep.subr.bf16.mxu1 %v2539_v18 }
 0x190   :  { %2164 = vmatpush3.bf16.msra.mxu1 %v2413_v52 }
 0x191   :  { %2165 = vmatprep.subr.bf16.mxu1 %v2539_v18 }
 0x194   :  { %2166 = vmatpush3.bf16.msra.mxu1 %v2414_v61 }
 0x195   :  { %2167 = vmatprep.subr.bf16.mxu1 %v2539_v18 }
 0x198   :  { %2168 = vmatpush3.bf16.msra.mxu1 %v2415_v62 }
 0x199   :  { %2169 = vmatprep.subr.bf16.mxu1 %v2539_v18 }
 0x19c   :  { %2170 = vmatpush3.bf16.msra.mxu1 %v2416_v63 }
 0x19d   :  { %v2085_v48 = vpop.f32.mrf.mxu0  ;;  %2171 = vmatprep.subr.bf16.mxu1 %v2539_v18 }
 0x19f   :  { %v2086_v49 = vpop.f32.mrf.mxu0 }
 0x1a0   :  { %v2087_v51 = vadd.f32 %v2086_v49, %v2085_v48  ;;  %2172 = vmatpush3.bf16.msra.mxu1 %v2417_v0 }
 0x1a1   :  { %v2088_v53 = vpop.f32.mrf.mxu0  ;;  %2173 = vmatprep.subr.bf16.mxu1 %v2539_v18 }
 0x1a2   :  { %v1437_v54 = vadd.f32 %v2087_v51, %v1397_v50 }
 0x1a3   :  { %v2089_v55 = vpop.f32.mrf.mxu0 }
 0x1a4   :  { %v1477_v56 = vadd.f32 %v1476_v33, %v1437_v54  ;;  %2174 = vmatpush3.bf16.msra.mxu1 %v2418_v1 }
 0x1a6   :  { %v1484_v57 = vmax.f32 %v1477_v56, 0.0 }
 0x1a8   :  { %v1487_v58 = vpack.c.bf16 %v1484_v57, %v1484_v57 }
 0x1aa   :  { %2156 = vmatmul.mubr.bf16.vlgmr.msra.gmra.mxu0 %v1487_v58 }
 0x247   :  { %v2109_v2 = vpop.f32.mrf.mxu1 }
 0x249   :  { %v2110_v3 = vpop.f32.mrf.mxu1 }
 0x24a   :  { %v2111_v6 = vadd.f32 %v2110_v3, %v2109_v2 }
 0x24b   :  { %v2112_v4 = vpop.f32.mrf.mxu1 }
 0x24c   :  { %v1673_v8 = vadd.f32 %v2111_v6, %v1992_v7 }
 0x24d   :  { %v2113_v5 = vpop.f32.mrf.mxu1 }
 0x26a   :  { %v1712_v9 = vpop.f32.mrf.mxu0 }
 0x26b   :  { %v1713_v11 = vadd.f32 %v1712_v9, %v1673_v8 }
 0x26c   :  { %v2157_v12 = vpop.f32.mrf.mxu0 }
 0x26d   :  { %v1718_v13 = vmax.f32 %v1713_v11, 0.0 }
 0x26e   :  { %v1715_v14 = vpop.f32.mrf.mxu0 }
 0x26f   :  { %v1719_v15 = vpack.c.bf16 %v1718_v13, %v1718_v13 }
 0x270   :  { %v2158_v16 = vpop.f32.mrf.mxu0 }
 0x271   :  { %2176 = vmatmul.mubr.bf16.vlgmr.msra.gmra.mxu1 %v1719_v15 }
 0x331   :  { %v1802_v18 = vpop.f32.mrf.mxu1 }
 0x332   :  { %v1808_v17 = vrot.slane %v1802_v18, 4 }
 0x333   :  { %v2177_v19 = vpop.f32.mrf.mxu1 }
 0x334   :  { %v1809_v20 = vmax.f32 %v1802_v18, %v1808_v17 }
 0x335   :  { %v1805_v21 = vpop.f32.mrf.mxu1 }
 0x336   :  { %v1810_v22 = vrot.slane %v1809_v20, 2 }
 0x337   :  { %v2178_v23 = vpop.f32.mrf.mxu1 }
 0x338   :  { %v1811_v24 = vmax.f32 %v1809_v20, %v1810_v22 }
 0x33a   :  { %v1812_v25 = vrot.slane %v1811_v24, 1 }
 0x33c   :  { %v1813_v26 = vmax.f32 %v1811_v24, %v1812_v25 }
 0x33e   :  { %v1814_v10 = vsub.f32 %v1802_v18, %v1813_v26 }
 0x340   :  { %v1815_v27 = vmul.f32 1.442695, %v1814_v10 }
 0x342   :  { %2419 = vpow2.f32 %v1815_v27 }
 0x34f   :  { %v2420_v28 = vpop.eup %2419 }
 0x350   :  { %v1817_v29 = vrot.slane %v2420_v28, 4 }
 0x352   :  { %v1818_v30 = vadd.f32 %v2420_v28, %v1817_v29 }
 0x354   :  { %v1819_v31 = vrot.slane %v1818_v30, 2 }
 0x356   :  { %v1820_v32 = vadd.f32 %v1819_v31, %v1818_v30 }
 0x358   :  { %v1821_v33 = vrot.slane %v1820_v32, 1 }
 0x35a   :  { %v1822_v34 = vadd.f32 %v1821_v33, %v1820_v32 }
 0x35c   :  { %2421 = vrcp.f32 %v1822_v34 }
 0x369   :  { %v2422_v35 = vpop.eup %2421 }
 0x36a   :  { %v1824_v36 = vmul.f32 %v2422_v35, %v2420_v28 }
 0x36c   :  { %1825 = vst [vmem:[#allocation10] sm:$0xff] %v1824_v36 }
 0x36d   :  { %2514 = shalt.err (!%p2511_p10)
}
 0x36e   :  { %1835 = dma.vmem_to_hbm [thread:$0]  %s1833_s20, 128, %s2650_s6, [#allocation4]  }
 0x36f   :  { %2529 = dma.done.wait [#allocation4], 128  }
 0x370   :  { %2530 = vsyncadd [#allocation4], 4294967168 }
 0x371   :  { %1839 = vsyncpa [#allocation3], 1 }
 0x372   :  { %1840 = vsyncpa [#allocation6], 1 }
 0x373   :  { %1841 = vsyncpa [#allocation9], 1 }
 0x374   :  { %1842 = vsyncpa [#allocation4], 1 }

</bundles_post_ra>
